<compile_context>
chip_gen: v7x
topology: tpu7x:2x2x1
jax: 0.10.0
libtpu: 0.0.40
codegen_flags: <defaults>
</compile_context>

<pallas_src>
import jax
import jax.numpy as jnp
from jax.experimental import pallas as pl
from jax.experimental.pallas import tpu as pltpu

LANE = 128
_SMALL_BYTES = 2 * 1024 * 1024  # whole-array single-block path threshold


def _abs_kernel(x_ref, o_ref):
    # Elementwise absolute value on the current VMEM tile (VPU op).
    o_ref[...] = jnp.abs(x_ref[...])


def abs_pallas(x: jax.Array) -> jax.Array:
    """Elementwise |x| via a Pallas TPU kernel. Preserves shape and dtype."""
    orig_shape = x.shape
    dtype = x.dtype
    n = x.size
    if n == 0:
        return x

    # Flatten to a lane-dense 2D slab. Reshapes are free bitcasts; padding is
    # only taken when the total element count is not a multiple of 128.
    pad = (-n) % LANE
    x_flat = x.reshape(-1)
    if pad:
        x_flat = jnp.pad(x_flat, (0, pad))
    rows = x_flat.size // LANE
    x2d = x_flat.reshape(rows, LANE)

    nbytes = rows * LANE * dtype.itemsize

    if nbytes <= _SMALL_BYTES:
        # Single whole-array block resident in VMEM: no grid, no index_map,
        # no per-step pipelining overhead.
        out2d = pl.pallas_call(
            _abs_kernel,
            out_shape=jax.ShapeDtypeStruct((rows, LANE), dtype),
            in_specs=[pl.BlockSpec(memory_space=pltpu.MemorySpace.VMEM)],
            out_specs=pl.BlockSpec(memory_space=pltpu.MemorySpace.VMEM),
            input_output_aliases={0: 0},
        )(x2d)
    else:
        # Large inputs: big lane-dense tiles near the HBM roofline.
        # 1024 rows x 128 lanes x 4 B = 512 KiB per f32 buffer; with double
        # buffering on in+out that is 2 MiB — well under default scoped VMEM.
        # 1024 is a multiple of every packed sublane count (8/16/32), so the
        # block is layout-clean for f32, bf16 and int8/fp8 alike.
        block_rows = 1024
        grid = (pl.cdiv(rows, block_rows),)
        out2d = pl.pallas_call(
            _abs_kernel,
            out_shape=jax.ShapeDtypeStruct((rows, LANE), dtype),
            grid=grid,
            in_specs=[pl.BlockSpec((block_rows, LANE), lambda i: (i, 0))],
            out_specs=pl.BlockSpec((block_rows, LANE), lambda i: (i, 0)),
            input_output_aliases={0: 0},
            compiler_params=pltpu.CompilerParams(
                dimension_semantics=("parallel",),  # shards across TCs on v7x
            ),
        )(x2d)

    out_flat = out2d.reshape(-1)
    if pad:
        out_flat = out_flat[:n]
    return out_flat.reshape(orig_shape)


if __name__ == "__main__":
    key = jax.random.PRNGKey(0)
    x = jax.random.normal(key, (2, 4, 16, 16), dtype=jnp.float32)

    y = abs_pallas(x)
    jax.block_until_ready(y)

    # Correctness check against plain JAX reference.
    y_ref = jnp.abs(x)
    assert y.shape == x.shape and y.dtype == x.dtype
    assert bool(jnp.allclose(y, y_ref)), "mismatch vs jnp.abs reference"

    print("KERNEL_OK")
</pallas_src>

<mosaic_0001>
module attributes {stable_mosaic.version = 11 : i64} {
  func.func @_abs_kernel(%arg0: memref<16x128xf32, #tpu.memory_space<vmem>>, %arg1: memref<16x128xf32, #tpu.memory_space<vmem>>) attributes {dimension_semantics = [], scalar_prefetch = 0 : i64, scratch_operands = 0 : i64, tpu.core_type = #tpu.core_type<tc>} {
    %c0 = arith.constant 0 : index
    %c0_0 = arith.constant 0 : index
    %0 = vector.load %arg0[%c0, %c0_0] : memref<16x128xf32, #tpu.memory_space<vmem>>, vector<16x128xf32>
    %1 = math.absf %0 : vector<16x128xf32>
    %c0_1 = arith.constant 0 : index
    %c0_2 = arith.constant 0 : index
    %2 = vector.load %arg1[%c0_1, %c0_2] : memref<16x128xf32, #tpu.memory_space<vmem>>, vector<16x128xf32>
    tpu.vector_store %arg1[%c0_1, %c0_2], %1 {strides = array<i32>} : memref<16x128xf32, #tpu.memory_space<vmem>>, vector<16x128xf32>,
    return
  }
}

</mosaic_0001>

<bundles_post_ra>
// kernel: tpu_custom_call.1
= control target key start
LH: loop header
LB: loop body
LE: loop exit
PB: predicated region body
PF: predicated region fallthrough
CT: control target
= control target key end

     0   :  { %6 = vsyncpa [#allocation3], 0  ;;  %s136_s0 = inlined_call_operand.hbm [shape: f32[16,128], index: 0, kind: input, shape index: {}, may-alias: {0,1}]   ;;  %s137_s1 = inlined_call_operand.hbm [shape: f32[16,128], index: 1, kind: output, shape index: {}, may-alias: {0,1}]  }
   0x1   :  { %7 = vsyncpa [#allocation4], 0  ;;  %s98_s6 = smov [#allocation2]   ;;  %s50_s10 = scalar_lea.hbm %s136_s0, 256 }
   0x2   :  { %s13_s7 = sshll.u32 %s98_s6, 4  ;;  %p51_p0 = scmp.ne.s32.totalorder %s136_s0, %s50_s10  ;;  %s14_s7 = int_to_ptr.vmem [resolvable:$true] %s13_s7 }
   0x3   :  { %p54_p1 = scmp.lt.u32.totalorder %s50_s10, %s136_s0 }
   0x5   :  { %p56_p2 = pnand %p54_p1, %p51_p0 }
   0x7   :  { %59 = shalt.err (!%p56_p2)
}
   0x8   :  { %s60_s15 = scalar_lea.vmem %s14_s7, 256  ;;  %p65_p4 = scmp.lt.s32.totalorder %s14_s7, %s14_s7 }
   0x9   :  { %p61_p3 = scmp.ne.s32.totalorder %s14_s7, %s60_s15  ;;  %p66_p5 = scmp.lt.s32.totalorder %s60_s15, %s60_s15 }
   0xb   :  { %p67_p6 = por %p66_p5, %p65_p4 }
   0xd   :  { %p68_p7 = pnand %p67_p6, %p61_p3 }
   0xf   :  { %71 = shalt.err (!%p68_p7)
}
  0x10   :  { %s99_s16 = smov 128   ;;  %s100_s17 = smov 8  }
  0x11   :  { %19 = dma.hbm_to_vmem [thread:$0]  %s136_s0, 256, %s14_s7, [#allocation3], %s99_s16, %s99_s16, %s100_s17  }
  0x12   :  { %94 = dma.done.wait [#allocation3], 256  }
  0x13   :  { %95 = vsyncadd [#allocation3], 4294967040  ;;  %s101_s20 = smov [#allocation5]   ;;  %v23_v0 = vld [vmem:[#allocation2] sm:$0xff]  ;;  %v24_v1 = vld [vmem:[#allocation2 + $0x8] sm:$0xff] }
  0x14   :  { %s34_s21 = sshll.u32 %s101_s20, 4  ;;  %v25_v2 = vand.u32 2147483647, %v23_v0  ;;  %v26_v3 = vand.u32 2147483647, %v24_v1  ;;  %s35_s21 = int_to_ptr.vmem [resolvable:$true] %s34_s21 }
  0x15   :  { %s72_s22 = scalar_lea.vmem %s35_s21, 256  ;;  %p77_p9 = scmp.lt.s32.totalorder %s35_s21, %s35_s21 }
  0x16   :  { %27 = vst [vmem:[#allocation5] sm:$0xff] %v25_v2  ;;  %28 = vst [vmem:[#allocation5 + $0x8] sm:$0xff] %v26_v3  ;;  %p73_p8 = scmp.ne.s32.totalorder %s35_s21, %s72_s22  ;;  %p78_p10 = scmp.lt.s32.totalorder %s72_s22, %s72_s22 }
  0x18   :  { %p79_p11 = por %p78_p10, %p77_p9 }
  0x1a   :  { %p80_p12 = pnand %p79_p11, %p73_p8 }
  0x1c   :  { %83 = shalt.err (!%p80_p12)
}
  0x1d   :  { %s84_s24 = scalar_lea.hbm %s137_s1, 256 }
  0x1e   :  { %p85_p13 = scmp.ne.s32.totalorder %s137_s1, %s84_s24  ;;  %p88_p0 = scmp.lt.u32.totalorder %s84_s24, %s137_s1 }
  0x20   :  { %p90_p1 = pnand %p88_p0, %p85_p13 }
  0x22   :  { %93 = shalt.err (!%p90_p1)
}
  0x23   :  { %40 = dma.vmem_to_hbm [thread:$0]  %s35_s21, 256, %s137_s1, [#allocation4], %s99_s16, %s99_s16, %s100_s17  }
  0x24   :  { %96 = dma.done.wait [#allocation4], 256  }
  0x25   :  { %97 = vsyncadd [#allocation4], 4294967040 }
  0x26   :  { %44 = vsyncpa [#allocation3], 1 }
  0x27   :  { %45 = vsyncpa [#allocation4], 1 }

</bundles_post_ra>
